<compile_context>
chip_gen: v7x
topology: tpu7x:2x2x1
jax: 0.10.0
libtpu: 0.0.40
codegen_flags: <defaults>
</compile_context>

<pallas_src>
import jax
import jax.numpy as jnp
from jax.experimental import pallas as pl
from jax.experimental.pallas import tpu as pltpu

SHAPE_CLASSES = 16
NUM_PARTS = [4, 2, 2, 4, 4, 3, 3, 2, 4, 2, 6, 2, 3, 3, 3, 3]
LANES_PER_HEAD = 8                            # max(num_parts)=6 rounded up
OUT_LANES = SHAPE_CLASSES * LANES_PER_HEAD    # 128: one lane-dense output slab
BN_EPS = 1e-5


def _fused_heads_kernel(x_ref, w1_ref, scale_ref, shift_ref, w2_ref, b2_ref,
                        o_ref):
    """One row tile: x @ W1_big -> folded BN -> ReLU -> @ W2_big + b2."""
    x = x_ref[...]                                                   # (tm, C)
    h = jnp.dot(x, w1_ref[...], preferred_element_type=jnp.float32)  # (tm, 16C)
    h = h * scale_ref[...] + shift_ref[...]                          # folded BN
    h = jnp.maximum(h, 0.0)                                          # ReLU
    o = jnp.dot(h, w2_ref[...], preferred_element_type=jnp.float32)  # (tm, 128)
    o_ref[...] = (o + b2_ref[...]).astype(o_ref.dtype)


def multi_seg_head_pallas(x_bcn, params, *, tm=512):
    """x_bcn: (B, C, N) float32.  Returns list of (B, num_parts[i], N)."""
    B, C, N = x_bcn.shape
    M = B * N
    H = SHAPE_CLASSES * C

    # (B, C, N) -> (M, C): points on sublanes, channels on lanes.
    x_flat = jnp.transpose(x_bcn, (0, 2, 1)).reshape(M, C)

    # Row tile: multiple of 8, capped at 512; pad M up to a tile multiple.
    tm = min(tm, ((M + 7) // 8) * 8)
    tm = max(8, (tm // 8) * 8)
    grid_m = (M + tm - 1) // tm
    M_pad = grid_m * tm
    if M_pad != M:
        x_flat = jnp.pad(x_flat, ((0, M_pad - M), (0, 0)))

    w1_big, scale_big, shift_big, w2_big, b2_big = params["fused"]

    flops = 2 * M_pad * (C * H + H * OUT_LANES)
    bytes_accessed = 4 * (M_pad * C + C * H + 2 * H + H * OUT_LANES
                          + OUT_LANES + M_pad * OUT_LANES)

    out = pl.pallas_call(
        _fused_heads_kernel,
        out_shape=jax.ShapeDtypeStruct((M_pad, OUT_LANES), jnp.float32),
        grid_spec=pltpu.PrefetchScalarGridSpec(
            num_scalar_prefetch=0,
            grid=(grid_m,),
            in_specs=[
                pl.BlockSpec((tm, C), lambda m: (m, 0)),            # x row tile
                pl.BlockSpec((C, H), lambda m: (0, 0)),             # W1_big
                pl.BlockSpec((1, H), lambda m: (0, 0)),             # BN scale
                pl.BlockSpec((1, H), lambda m: (0, 0)),             # BN shift
                pl.BlockSpec((H, OUT_LANES), lambda m: (0, 0)),     # W2_big
                pl.BlockSpec((1, OUT_LANES), lambda m: (0, 0)),     # b2 packed
            ],
            out_specs=pl.BlockSpec((tm, OUT_LANES), lambda m: (m, 0)),
        ),
        compiler_params=pltpu.CompilerParams(
            dimension_semantics=("parallel",)),
        cost_estimate=pl.CostEstimate(
            flops=flops, transcendentals=0, bytes_accessed=bytes_accessed),
    )(x_flat, w1_big, scale_big, shift_big, w2_big, b2_big)

    # Glue: strip row padding, slice head i's lanes [i*8, i*8+p_i),
    # back to PyTorch's (B, P_i, N).
    out = out[:M].reshape(B, N, OUT_LANES)
    logits_all_shapes = []
    for i, p in enumerate(NUM_PARTS):
        o = out[..., i * LANES_PER_HEAD: i * LANES_PER_HEAD + p]   # (B, N, p)
        logits_all_shapes.append(jnp.transpose(o, (0, 2, 1)))      # (B, p, N)
    return logits_all_shapes


def init_params(key, in_channels):
    """Deterministic synthetic parameters for all 16 heads, fused for the kernel."""
    C = in_channels
    H = SHAPE_CLASSES * C
    keys = jax.random.split(key, SHAPE_CLASSES * 6)

    raw = []  # per-head params for the pure-JAX reference
    w1_big = jnp.zeros((C, H), jnp.float32)
    scale_big = jnp.zeros((1, H), jnp.float32)
    shift_big = jnp.zeros((1, H), jnp.float32)
    w2_big = jnp.zeros((H, OUT_LANES), jnp.float32)   # block-diagonal classifier
    b2_big = jnp.zeros((1, OUT_LANES), jnp.float32)

    for i, p in enumerate(NUM_PARTS):
        k = keys[i * 6:(i + 1) * 6]
        w1 = jax.random.normal(k[0], (C, C), jnp.float32) * 0.05   # conv1 (out,in)
        b1 = jax.random.normal(k[1], (C,), jnp.float32) * 0.01
        gamma = 1.0 + 0.1 * jax.random.normal(k[2], (C,), jnp.float32)
        beta = 0.1 * jax.random.normal(k[3], (C,), jnp.float32)
        mean = jnp.zeros((C,), jnp.float32)                        # eval-mode BN stats
        var = jnp.ones((C,), jnp.float32)
        w2 = jax.random.normal(k[4], (p, C), jnp.float32) * 0.05   # conv2 (out,in)
        b2 = jax.random.normal(k[5], (p,), jnp.float32) * 0.01
        raw.append((w1, b1, gamma, beta, mean, var, w2, b2))

        # Fold BN + conv1 bias into per-channel scale/shift.
        scale = gamma / jnp.sqrt(var + BN_EPS)
        shift = (b1 - mean) * scale + beta

        c0 = i * C
        l0 = i * LANES_PER_HEAD
        w1_big = w1_big.at[:, c0:c0 + C].set(w1.T)                 # (C_in, C_out)
        scale_big = scale_big.at[0, c0:c0 + C].set(scale)
        shift_big = shift_big.at[0, c0:c0 + C].set(shift)
        w2_big = w2_big.at[c0:c0 + C, l0:l0 + p].set(w2.T)
        b2_big = b2_big.at[0, l0:l0 + p].set(b2)

    fused = (w1_big, scale_big, shift_big, w2_big, b2_big)
    return {"fused": fused, "raw": raw}


def reference_forward(x_bcn, params):
    """Pure-JAX reference reproducing the PyTorch forward (eval-mode BN)."""
    B, C, N = x_bcn.shape
    xs = jnp.transpose(x_bcn, (0, 2, 1)).reshape(-1, C)
    outs = []
    for i, p in enumerate(NUM_PARTS):
        w1, b1, gamma, beta, mean, var, w2, b2 = params["raw"][i]
        h = xs @ w1.T + b1
        h = (h - mean) / jnp.sqrt(var + BN_EPS) * gamma + beta
        h = jnp.maximum(h, 0.0)
        o = h @ w2.T + b2
        outs.append(jnp.transpose(o.reshape(B, N, p), (0, 2, 1)))
    return outs


if __name__ == "__main__":
    # TODO(synk): BN uses running statistics (eval mode); training-mode batch
    # statistics and the (dropout=0) Dropout layer are not modeled.
    B, C, N = 2, 32, 64
    key = jax.random.PRNGKey(0)
    k_x, k_p = jax.random.split(key)
    x = jax.random.normal(k_x, (B, C, N), jnp.float32)  # PyTorch NCW input
    params = init_params(k_p, C)

    logits = multi_seg_head_pallas(x, params)
    logits = jax.block_until_ready(logits)

    ref = reference_forward(x, params)
    ok = True
    for i in range(SHAPE_CLASSES):
        assert logits[i].shape == (B, NUM_PARTS[i], N), logits[i].shape
        if not jnp.allclose(logits[i], ref[i], atol=1e-3, rtol=1e-3):
            ok = False
    print("KERNEL_OK" if ok else "MISMATCH")
</pallas_src>

<mosaic_0001>
module attributes {stable_mosaic.version = 11 : i64} {
  func.func @_fused_heads_kernel(%arg0: i32, %arg1: memref<128x32xf32, #tpu.memory_space<vmem>>, %arg2: memref<32x512xf32, #tpu.memory_space<vmem>>, %arg3: memref<1x512xf32, #tpu.memory_space<vmem>>, %arg4: memref<1x512xf32, #tpu.memory_space<vmem>>, %arg5: memref<512x128xf32, #tpu.memory_space<vmem>>, %arg6: memref<1x128xf32, #tpu.memory_space<vmem>>, %arg7: memref<128x128xf32, #tpu.memory_space<vmem>>) attributes {dimension_semantics = [#tpu.dimension_semantics<parallel>], iteration_bounds = array<i64: 1>, scalar_prefetch = 0 : i64, scratch_operands = 0 : i64, tpu.core_type = #tpu.core_type<tc>, window_params = [{transform_indices = @transform_0, window_bounds = array<i64: 128, 32>}, {pipeline_mode = #tpu.pipeline_mode<synchronous>, transform_indices = @transform_1, window_bounds = array<i64: 32, 512>}, {pipeline_mode = #tpu.pipeline_mode<synchronous>, transform_indices = @transform_2, window_bounds = array<i64: 1, 512>}, {pipeline_mode = #tpu.pipeline_mode<synchronous>, transform_indices = @transform_3, window_bounds = array<i64: 1, 512>}, {pipeline_mode = #tpu.pipeline_mode<synchronous>, transform_indices = @transform_4, window_bounds = array<i64: 512, 128>}, {pipeline_mode = #tpu.pipeline_mode<synchronous>, transform_indices = @transform_5, window_bounds = array<i64: 1, 128>}, {transform_indices = @transform_6, window_bounds = array<i64: 128, 128>}]} {
    %c0 = arith.constant 0 : index
    %c0_0 = arith.constant 0 : index
    %0 = vector.load %arg1[%c0, %c0_0] : memref<128x32xf32, #tpu.memory_space<vmem>>, vector<128x32xf32>
    %c0_1 = arith.constant 0 : index
    %c0_2 = arith.constant 0 : index
    %1 = vector.load %arg2[%c0_1, %c0_2] : memref<32x512xf32, #tpu.memory_space<vmem>>, vector<32x512xf32>
    %cst = arith.constant dense<0.000000e+00> : vector<128x512xf32>
    %2 = tpu.matmul %0, %1, %cst {dimension_numbers = #tpu.dot_dimension_numbers<[1], [0], [0], [1], [0, 0, 1, 1], [], []>} : vector<128x32xf32>, vector<32x512xf32>, vector<128x512xf32> -> vector<128x512xf32>
    %c0_3 = arith.constant 0 : index
    %c0_4 = arith.constant 0 : index
    %3 = vector.load %arg3[%c0_3, %c0_4] : memref<1x512xf32, #tpu.memory_space<vmem>>, vector<1x512xf32>
    %4 = vector.broadcast %3 : vector<1x512xf32> to vector<128x512xf32>
    %5 = arith.mulf %2, %4 : vector<128x512xf32>
    %c0_5 = arith.constant 0 : index
    %c0_6 = arith.constant 0 : index
    %6 = vector.load %arg4[%c0_5, %c0_6] : memref<1x512xf32, #tpu.memory_space<vmem>>, vector<1x512xf32>
    %7 = vector.broadcast %6 : vector<1x512xf32> to vector<128x512xf32>
    %8 = arith.addf %5, %7 : vector<128x512xf32>
    %cst_7 = arith.constant 0.000000e+00 : f32
    %9 = vector.broadcast %cst_7 : f32 to vector<128x512xf32>
    %10 = arith.maximumf %8, %9 : vector<128x512xf32>
    %c0_8 = arith.constant 0 : index
    %c0_9 = arith.constant 0 : index
    %11 = vector.load %arg5[%c0_8, %c0_9] : memref<512x128xf32, #tpu.memory_space<vmem>>, vector<512x128xf32>
    %cst_10 = arith.constant dense<0.000000e+00> : vector<128x128xf32>
    %12 = tpu.matmul %10, %11, %cst_10 {dimension_numbers = #tpu.dot_dimension_numbers<[1], [0], [0], [1], [0, 0, 1, 1], [], []>} : vector<128x512xf32>, vector<512x128xf32>, vector<128x128xf32> -> vector<128x128xf32>
    %c0_11 = arith.constant 0 : index
    %c0_12 = arith.constant 0 : index
    %13 = vector.load %arg6[%c0_11, %c0_12] : memref<1x128xf32, #tpu.memory_space<vmem>>, vector<1x128xf32>
    %14 = vector.broadcast %13 : vector<1x128xf32> to vector<128x128xf32>
    %15 = arith.addf %12, %14 : vector<128x128xf32>
    %c0_13 = arith.constant 0 : index
    %c0_14 = arith.constant 0 : index
    %16 = vector.load %arg7[%c0_13, %c0_14] : memref<128x128xf32, #tpu.memory_space<vmem>>, vector<128x128xf32>
    tpu.vector_store %arg7[%c0_13, %c0_14], %15 {strides = array<i32>} : memref<128x128xf32, #tpu.memory_space<vmem>>, vector<128x128xf32>,
    return
  }
  func.func @transform_0(%arg0: i32) -> (i32, i32) {
    %c0_i32 = arith.constant 0 : i32
    %c0_i32_0 = arith.constant 0 : i32
    return %arg0, %c0_i32 : i32, i32
  }
  func.func @transform_1(%arg0: i32) -> (i32, i32) {
    %c0_i32 = arith.constant 0 : i32
    %c0_i32_0 = arith.constant 0 : i32
    %c0_i32_1 = arith.constant 0 : i32
    return %c0_i32, %c0_i32_0 : i32, i32
  }
  func.func @transform_2(%arg0: i32) -> (i32, i32) {
    %c0_i32 = arith.constant 0 : i32
    %c0_i32_0 = arith.constant 0 : i32
    %c0_i32_1 = arith.constant 0 : i32
    return %c0_i32, %c0_i32_0 : i32, i32
  }
  func.func @transform_3(%arg0: i32) -> (i32, i32) {
    %c0_i32 = arith.constant 0 : i32
    %c0_i32_0 = arith.constant 0 : i32
    %c0_i32_1 = arith.constant 0 : i32
    return %c0_i32, %c0_i32_0 : i32, i32
  }
  func.func @transform_4(%arg0: i32) -> (i32, i32) {
    %c0_i32 = arith.constant 0 : i32
    %c0_i32_0 = arith.constant 0 : i32
    %c0_i32_1 = arith.constant 0 : i32
    return %c0_i32, %c0_i32_0 : i32, i32
  }
  func.func @transform_5(%arg0: i32) -> (i32, i32) {
    %c0_i32 = arith.constant 0 : i32
    %c0_i32_0 = arith.constant 0 : i32
    %c0_i32_1 = arith.constant 0 : i32
    return %c0_i32, %c0_i32_0 : i32, i32
  }
  func.func @transform_6(%arg0: i32) -> (i32, i32) {
    %c0_i32 = arith.constant 0 : i32
    %c0_i32_0 = arith.constant 0 : i32
    return %arg0, %c0_i32 : i32, i32
  }
}

</mosaic_0001>

<bundles_post_ra>
// kernel: tpu_custom_call.1
= control target key start
LH: loop header
LB: loop body
LE: loop exit
PB: predicated region body
PF: predicated region fallthrough
CT: control target
= control target key end

     0   :  { %11 = vsyncpa [#allocation3], 0  ;;  %s1798_s0 = inlined_call_operand.vmem [shape: f32[128,32], index: 0, kind: input, shape index: {}]   ;;  %s1799_s1 = inlined_call_operand.vmem [shape: f32[32,512], index: 1, kind: input, shape index: {}]   ;;  %s1800_s2 = inlined_call_operand.vmem [shape: f32[1,512], index: 2, kind: input, shape index: {}]   ;;  %s1801_s3 = inlined_call_operand.vmem [shape: f32[1,512], index: 3, kind: input, shape index: {}]   ;;  %s1802_s4 = inlined_call_operand.hbm [shape: f32[512,128], index: 4, kind: input, shape index: {}]   ;;  %s1803_s5 = inlined_call_operand.vmem [shape: f32[1,128], index: 5, kind: input, shape index: {}]   ;;  %s1804_s6 = inlined_call_operand.hbm [shape: f32[128,128], index: 6, kind: output, shape index: {}]  }
   0x1   :  { %12 = vsyncpa [#allocation4], 0  ;;  %s1397_s21 = smov [#allocation2]   ;;  %s1349_s25 = scalar_lea.hbm %s1802_s4, 8192 }
   0x2   :  { %s26_s22 = sshll.u32 %s1397_s21, 4  ;;  %p1350_p0 = scmp.ne.s32.totalorder %s1802_s4, %s1349_s25  ;;  %s27_s22 = int_to_ptr.vmem [resolvable:$true] %s26_s22 }
   0x3   :  { %p1353_p1 = scmp.lt.u32.totalorder %s1349_s25, %s1802_s4 }
   0x5   :  { %p1355_p2 = pnand %p1353_p1, %p1350_p0 }
   0x7   :  { %1358 = shalt.err (!%p1355_p2)
}
   0x8   :  { %s1359_s30 = scalar_lea.vmem %s27_s22, 8192  ;;  %p1364_p4 = scmp.lt.s32.totalorder %s27_s22, %s27_s22 }
   0x9   :  { %p1360_p3 = scmp.ne.s32.totalorder %s27_s22, %s1359_s30  ;;  %p1365_p5 = scmp.lt.s32.totalorder %s1359_s30, %s1359_s30 }
   0xb   :  { %p1366_p6 = por %p1365_p5, %p1364_p4 }
   0xd   :  { %p1367_p7 = pnand %p1366_p6, %p1360_p3 }
   0xf   :  { %1370 = shalt.err (!%p1367_p7)
}
  0x10   :  { %s1398_s7 = smov 128   ;;  %s1399_s8 = smov 8  }
  0x11   :  { %32 = dma.hbm_to_vmem [thread:$0]  %s1802_s4, 8192, %s27_s22, [#allocation3], %s1398_s7, %s1398_s7, %s1399_s8  }
  0x12   :  { %1393 = dma.done.wait [#allocation3], 8192  }
  0x13   :  { %1394 = vsyncadd [#allocation3], 4294959104  ;;  %v1400_v0 = vmov 0.0   ;;  %v55_v1 = vld [vmem:[%s1799_s1 + $0x8] sm:$0xff]  ;;  %v57_v3 = vld [vmem:[%s1799_s1 + $0x18] sm:$0xff]  ;;  %vm70_vm0 = vcmask 261120  }
  0x14   :  { %183 = vmatprep.mubr.f32.mxu0 %v1400_v0  ;;  %344 = vmatprep.mubr.f32.mxu1 %v1400_v0  ;;  %v59_v2 = vld [vmem:[%s1799_s1 + $0x28] sm:$0xff]  ;;  %v61_v5 = vld [vmem:[%s1799_s1 + $0x38] sm:$0xff]  ;;  %v54_v6 = vld [vmem:[%s1799_s1] sm:$0xff] }
  0x15   :  { %v1264_v4 = vpack.c.bf16 %v59_v2, %v55_v1  ;;  %v58_v7 = vld [vmem:[%s1799_s1 + $0x20] sm:$0xff]  ;;  %v1272_v8 = vpack.c.bf16 %v61_v5, %v57_v3  ;;  %v56_v10 = vld [vmem:[%s1799_s1 + $0x10] sm:$0xff]  ;;  %v63_v12 = vld [vmem:[%s1799_s1 + $0x48] sm:$0xff] }
  0x16   :  { %v1266_v9 = vpack.c.bf16 %v58_v7, %v54_v6  ;;  %v60_v11 = vld [vmem:[%s1799_s1 + $0x30] sm:$0xff]  ;;  %v67_v14 = vld [vmem:[%s1799_s1 + $0x68] sm:$0xff]  ;;  %v65_v15 = vld [vmem:[%s1799_s1 + $0x58] sm:$0xff] }
  0x17   :  { %1265 = vmatprep.subr.bf16.mxu0 %v1264_v4  ;;  %v1274_v13 = vpack.c.bf16 %v60_v11, %v56_v10  ;;  %v69_v16 = vld [vmem:[%s1799_s1 + $0x78] sm:$0xff]  ;;  %1273 = vmatprep.subr.bf16.mxu1 %v1272_v8  ;;  %v1268_v17 = vpack.c.bf16 %v67_v14, %v63_v12  ;;  %v62_v19 = vld [vmem:[%s1799_s1 + $0x40] sm:$0xff]  ;;  %v64_v21 = vld [vmem:[%s1799_s1 + $0x50] sm:$0xff] }
  0x18   :  { %1267 = vmatpush1.bf16.msra.mxu0 %v1266_v9  ;;  %v1276_v18 = vpack.c.bf16 %v69_v16, %v65_v15  ;;  %v66_v20 = vld [vmem:[%s1799_s1 + $0x60] sm:$0xff]  ;;  %v68_v23 = vld [vmem:[%s1799_s1 + $0x70] sm:$0xff]  ;;  %v39_v26 = vld [vmem:[%s1798_s0 + $0x8] sm:$0xff] }
  0x19   :  { %1275 = vmatpush1.bf16.msra.mxu1 %v1274_v13  ;;  %v1270_v22 = vpack.c.bf16 %v66_v20, %v62_v19  ;;  %1269 = vmatprep.subr.bf16.mxu0 %v1268_v17  ;;  %v1278_v24 = vpack.c.bf16 %v68_v23, %v64_v21  ;;  %v38_v25 = vld [vmem:[%s1798_s0] sm:$0xff]  ;;  %v694_v28 = vld [vmem:[#allocation2 + $0x88] sm:$0xff]  ;;  %v695_v38 = vld [vmem:[#allocation2 + $0x90] sm:$0xff] }
  0x1a   :  { %1277 = vmatprep.subr.bf16.mxu1 %v1276_v18  ;;  %v693_v27 = vld [vmem:[#allocation2 + $0x80] sm:$0xff]  ;;  %v678_v30 = vld [vmem:[#allocation2 + $0x8] sm:$0xff]  ;;  %v696_v39 = vld [vmem:[#allocation2 + $0x98] sm:$0xff] }
  0x1b   :  { %v677_v29 = vld [vmem:[#allocation2] sm:$0xff]  ;;  %v1280_v31 = vpack.c.bf16 %v694_v28, %v693_v27  ;;  %v726_v33 = vld [vmem:[#allocation2 + $0x188] sm:$0xff]  ;;  %v1284_v41 = vpack.c.bf16 %v696_v39, %v695_v38  ;;  %v679_v42 = vld [vmem:[#allocation2 + $0x10] sm:$0xff] }
  0x1c   :  { %1271 = vmatpush1.bf16.msra.mxu0 %v1270_v22  ;;  %v725_v32 = vld [vmem:[#allocation2 + $0x180] sm:$0xff]  ;;  %v1282_v35 = vpack.c.bf16 %v678_v30, %v677_v29  ;;  %v710_v37 = vld [vmem:[#allocation2 + $0x108] sm:$0xff]  ;;  %v680_v43 = vld [vmem:[#allocation2 + $0x18] sm:$0xff] }
  0x1d   :  { %1279 = vmatpush1.bf16.msra.mxu1 %v1278_v24  ;;  %v709_v34 = vld [vmem:[#allocation2 + $0x100] sm:$0xff]  ;;  %v1312_v36 = vpack.c.bf16 %v726_v33, %v725_v32  ;;  %1281 = vmatprep.subr.bf16.mxu0 %v1280_v31  ;;  %v727_v44 = vld [vmem:[#allocation2 + $0x190] sm:$0xff]  ;;  %v728_v45 = vld [vmem:[#allocation2 + $0x198] sm:$0xff]  ;;  %v1286_v52 = vpack.c.bf16 %v680_v43, %v679_v42 }
  0x1e   :  { %v1314_v40 = vpack.c.bf16 %v710_v37, %v709_v34  ;;  %v711_v46 = vld [vmem:[#allocation2 + $0x110] sm:$0xff]  ;;  %v712_v47 = vld [vmem:[#allocation2 + $0x118] sm:$0xff]  ;;  %v1316_v49 = vpack.c.bf16 %v728_v45, %v727_v44  ;;  %v697_v50 = vld [vmem:[#allocation2 + $0xa0] sm:$0xff] }
  0x1f   :  { %1071 = vmatmul.mubr.msk.f32.vlgmr.msra.gmra.mrb[0].mxu0 %vm70_vm0, %v38_v25  ;;  %1313 = vmatprep.subr.bf16.mxu1 %v1312_v36  ;;  %v40_v48 = vld [vmem:[%s1798_s0 + $0x10] sm:$0xff]  ;;  %v698_v51 = vld [vmem:[#allocation2 + $0xa8] sm:$0xff]  ;;  %v729_v53 = vld [vmem:[#allocation2 + $0x1a0] sm:$0xff]  ;;  %v1318_v55 = vpack.c.bf16 %v712_v47, %v711_v46 }
  0x20   :  { %1087 = vmatmul.mubr.msk.f32.vlgmr.msra.gmra.mrb[0].mxu1 %vm70_vm0, %v38_v25  ;;  %189 = vmatprep.mubr.f32.mxu0 %v1400_v0  ;;  %v730_v54 = vld [vmem:[#allocation2 + $0x1a8] sm:$0xff]  ;;  %v1288_v56 = vpack.c.bf16 %v698_v51, %v697_v50  ;;  %v681_v57 = vld [vmem:[#allocation2 + $0x20] sm:$0xff]  ;;  %v699_v62 = vld [vmem:[#allocation2 + $0xb0] sm:$0xff] }
  0x21   :  { %350 = vmatprep.mubr.f32.mxu1 %v1400_v0  ;;  %1283 = vmatpush3.bf16.msra.mxu0 %v1282_v35  ;;  %v682_v58 = vld [vmem:[#allocation2 + $0x28] sm:$0xff]  ;;  %v713_v59 = vld [vmem:[#allocation2 + $0x120] sm:$0xff]  ;;  %v1320_v60 = vpack.c.bf16 %v730_v54, %v729_v53  ;;  %v700_v63 = vld [vmem:[#allocation2 + $0xb8] sm:$0xff] }
  0x22   :  { %1315 = vmatpush3.bf16.msra.mxu1 %v1314_v40  ;;  %1285 = vmatprep.subr.bf16.mxu0 %v1284_v41  ;;  %v714_v61 = vld [vmem:[#allocation2 + $0x128] sm:$0xff]  ;;  %v41_v1 = vld [vmem:[%s1798_s0 + $0x18] sm:$0xff]  ;;  %v731_v2 = vld [vmem:[#allocation2 + $0x1b0] sm:$0xff]  ;;  %v1290_v4 = vpack.c.bf16 %v682_v58, %v681_v57  ;;  %v1292_v6 = vpack.c.bf16 %v700_v63, %v699_v62 }
  0x23   :  { %1072 = vmatmul.mubr.msk.f32.gmra.mrb[2].mxu0 %vm70_vm0, %v39_v26  ;;  %1317 = vmatprep.subr.bf16.mxu1 %v1316_v49  ;;  %v732_v3 = vld [vmem:[#allocation2 + $0x1b8] sm:$0xff]  ;;  %v1322_v5 = vpack.c.bf16 %v714_v61, %v713_v59  ;;  %v683_v7 = vld [vmem:[#allocation2 + $0x30] sm:$0xff]  ;;  %v701_v12 = vld [vmem:[#allocation2 + $0xc0] sm:$0xff] }
  0x24   :  { %1088 = vmatmul.mubr.msk.f32.gmra.mrb[2].mxu1 %vm70_vm0, %v39_v26  ;;  %195 = vmatprep.mubr.f32.mxu0 %v1400_v0  ;;  %v684_v8 = vld [vmem:[#allocation2 + $0x38] sm:$0xff]  ;;  %v715_v9 = vld [vmem:[#allocation2 + $0x130] sm:$0xff]  ;;  %v1324_v10 = vpack.c.bf16 %v732_v3, %v731_v2  ;;  %v702_v13 = vld [vmem:[#allocation2 + $0xc8] sm:$0xff] }
  0x25   :  { %356 = vmatprep.mubr.f32.mxu1 %v1400_v0  ;;  %1287 = vmatpush3.bf16.msra.mxu0 %v1286_v52  ;;  %v716_v11 = vld [vmem:[#allocation2 + $0x138] sm:$0xff]  ;;  %v42_v14 = vld [vmem:[%s1798_s0 + $0x20] sm:$0xff]  ;;  %v734_v16 = vld [vmem:[#allocation2 + $0x1c8] sm:$0xff]  ;;  %v1294_v17 = vpack.c.bf16 %v684_v8, %v683_v7  ;;  %v1296_v19 = vpack.c.bf16 %v702_v13, %v701_v12 }
  0x26   :  { %1319 = vmatpush3.bf16.msra.mxu1 %v1318_v55  ;;  %1289 = vmatprep.subr.bf16.mxu0 %v1288_v56  ;;  %v733_v15 = vld [vmem:[#allocation2 + $0x1c0] sm:$0xff]  ;;  %v1326_v18 = vpack.c.bf16 %v716_v11, %v715_v9  ;;  %v686_v21 = vld [vmem:[#allocation2 + $0x48] sm:$0xff]  ;;  %v703_v25 = vld [vmem:[#allocation2 + $0xd0] sm:$0xff] }
  0x27   :  { %1073 = vmatmul.mubr.msk.f32.gmra.mrb[4].mxu0 %vm70_vm0, %v40_v48  ;;  %1321 = vmatprep.subr.bf16.mxu1 %v1320_v60  ;;  %v685_v20 = vld [vmem:[#allocation2 + $0x40] sm:$0xff]  ;;  %v1328_v23 = vpack.c.bf16 %v734_v16, %v733_v15  ;;  %v718_v24 = vld [vmem:[#allocation2 + $0x148] sm:$0xff]  ;;  %v704_v26 = vld [vmem:[#allocation2 + $0xd8] sm:$0xff] }
  0x28   :  { %1089 = vmatmul.mubr.msk.f32.gmra.mrb[4].mxu1 %vm70_vm0, %v40_v48  ;;  %201 = vmatprep.mubr.f32.mxu0 %v1400_v0  ;;  %v717_v22 = vld [vmem:[#allocation2 + $0x140] sm:$0xff]  ;;  %v43_v27 = vld [vmem:[%s1798_s0 + $0x28] sm:$0xff]  ;;  %v735_v28 = vld [vmem:[#allocation2 + $0x1d0] sm:$0xff]  ;;  %v1298_v30 = vpack.c.bf16 %v686_v21, %v685_v20  ;;  %v1300_v32 = vpack.c.bf16 %v704_v26, %v703_v25 }
  0x29   :  { %362 = vmatprep.mubr.f32.mxu1 %v1400_v0  ;;  %1291 = vmatpush3.bf16.msra.mxu0 %v1290_v4  ;;  %v736_v29 = vld [vmem:[#allocation2 + $0x1d8] sm:$0xff]  ;;  %v1330_v31 = vpack.c.bf16 %v718_v24, %v717_v22  ;;  %v687_v33 = vld [vmem:[#allocation2 + $0x50] sm:$0xff]  ;;  %v705_v38 = vld [vmem:[#allocation2 + $0xe0] sm:$0xff] }
  0x2a   :  { %1323 = vmatpush3.bf16.msra.mxu1 %v1322_v5  ;;  %1293 = vmatprep.subr.bf16.mxu0 %v1292_v6  ;;  %v688_v34 = vld [vmem:[#allocation2 + $0x58] sm:$0xff]  ;;  %v719_v35 = vld [vmem:[#allocation2 + $0x150] sm:$0xff]  ;;  %v1332_v36 = vpack.c.bf16 %v736_v29, %v735_v28  ;;  %v706_v39 = vld [vmem:[#allocation2 + $0xe8] sm:$0xff] }
  0x2b   :  { %1074 = vmatmul.mubr.msk.f32.gmra.mrb[6].mxu0 %vm70_vm0, %v41_v1  ;;  %1325 = vmatprep.subr.bf16.mxu1 %v1324_v10  ;;  %v720_v37 = vld [vmem:[#allocation2 + $0x158] sm:$0xff]  ;;  %v44_v40 = vld [vmem:[%s1798_s0 + $0x30] sm:$0xff]  ;;  %v737_v41 = vld [vmem:[#allocation2 + $0x1e0] sm:$0xff]  ;;  %v1302_v43 = vpack.c.bf16 %v688_v34, %v687_v33  ;;  %v1304_v45 = vpack.c.bf16 %v706_v39, %v705_v38 }
  0x2c   :  { %1090 = vmatmul.mubr.msk.f32.gmra.mrb[6].mxu1 %vm70_vm0, %v41_v1  ;;  %207 = vmatprep.mubr.f32.mxu0 %v1400_v0  ;;  %v738_v42 = vld [vmem:[#allocation2 + $0x1e8] sm:$0xff]  ;;  %v1334_v44 = vpack.c.bf16 %v720_v37, %v719_v35  ;;  %v689_v46 = vld [vmem:[#allocation2 + $0x60] sm:$0xff]  ;;  %v45_v51 = vld [vmem:[%s1798_s0 + $0x38] sm:$0xff] }
  0x2d   :  { %368 = vmatprep.mubr.f32.mxu1 %v1400_v0  ;;  %1295 = vmatpush3.bf16.msra.mxu0 %v1294_v17  ;;  %v690_v47 = vld [vmem:[#allocation2 + $0x68] sm:$0xff]  ;;  %v1336_v48 = vpack.c.bf16 %v738_v42, %v737_v41  ;;  %v721_v49 = vld [vmem:[#allocation2 + $0x160] sm:$0xff]  ;;  %v48_v56 = vld [vmem:[%s1798_s0 + $0x50] sm:$0xff] }
  0x2e   :  { %1327 = vmatpush3.bf16.msra.mxu1 %v1326_v18  ;;  %1297 = vmatprep.subr.bf16.mxu0 %v1296_v19  ;;  %v722_v50 = vld [vmem:[#allocation2 + $0x168] sm:$0xff]  ;;  %v1306_v52 = vpack.c.bf16 %v690_v47, %v689_v46  ;;  %v46_v54 = vld [vmem:[%s1798_s0 + $0x40] sm:$0xff]  ;;  %v49_v57 = vld [vmem:[%s1798_s0 + $0x58] sm:$0xff] }
  0x2f   :  { %1075 = vmatmul.mubr.msk.f32.gmra.mrb[8].mxu0 %vm70_vm0, %v42_v14  ;;  %1329 = vmatprep.subr.bf16.mxu1 %v1328_v23  ;;  %v1338_v53 = vpack.c.bf16 %v722_v50, %v721_v49  ;;  %v47_v55 = vld [vmem:[%s1798_s0 + $0x48] sm:$0xff]  ;;  %v50_v58 = vld [vmem:[%s1798_s0 + $0x60] sm:$0xff]  ;;  %v52_v60 = vld [vmem:[%s1798_s0 + $0x70] sm:$0xff] }
  0x30   :  { %1091 = vmatmul.mubr.msk.f32.gmra.mrb[8].mxu1 %vm70_vm0, %v42_v14  ;;  %213 = vmatprep.mubr.f32.mxu0 %v1400_v0  ;;  %v51_v59 = vld [vmem:[%s1798_s0 + $0x68] sm:$0xff]  ;;  %v53_v61 = vld [vmem:[%s1798_s0 + $0x78] sm:$0xff]  ;;  %v707_v62 = vld [vmem:[#allocation2 + $0xf0] sm:$0xff] }
  0x31   :  { %374 = vmatprep.mubr.f32.mxu1 %v1400_v0  ;;  %1299 = vmatpush3.bf16.msra.mxu0 %v1298_v30  ;;  %v708_v63 = vld [vmem:[#allocation2 + $0xf8] sm:$0xff]  ;;  %v739_v1 = vld [vmem:[#allocation2 + $0x1f0] sm:$0xff]  ;;  %v441_v13 = vld [vmem:[%s1800_s2] sm:$0xf] }
  0x32   :  { %1331 = vmatpush3.bf16.msra.mxu1 %v1330_v31  ;;  %1301 = vmatprep.subr.bf16.mxu0 %v1300_v32  ;;  %v1308_v2 = vpack.c.bf16 %v708_v63, %v707_v62  ;;  %v691_v3 = vld [vmem:[#allocation2 + $0x70] sm:$0xff]  ;;  %v692_v4 = vld [vmem:[#allocation2 + $0x78] sm:$0xff]  ;;  %v527_v17 = vld [vmem:[%s1801_s3] sm:$0xf] }
  0x33   :  { %1076 = vmatmul.mubr.msk.f32.gmra.mrb[10].mxu0 %vm70_vm0, %v43_v27  ;;  %1333 = vmatprep.subr.bf16.mxu1 %v1332_v36  ;;  %v740_v5 = vld [vmem:[#allocation2 + $0x1f8] sm:$0xff]  ;;  %v1310_v6 = vpack.c.bf16 %v692_v4, %v691_v3  ;;  %v723_v8 = vld [vmem:[#allocation2 + $0x170] sm:$0xff] }
  0x34   :  { %1092 = vmatmul.mubr.msk.f32.gmra.mrb[10].mxu1 %vm70_vm0, %v43_v27  ;;  %219 = vmatprep.mubr.f32.mxu0 %v1400_v0  ;;  %v1340_v7 = vpack.c.bf16 %v740_v5, %v739_v1  ;;  %v724_v9 = vld [vmem:[#allocation2 + $0x178] sm:$0xff] }
  0x35   :  { %380 = vmatprep.mubr.f32.mxu1 %v1400_v0  ;;  %1303 = vmatpush3.bf16.msra.mxu0 %v1302_v43  ;;  %v1342_v10 = vpack.c.bf16 %v724_v9, %v723_v8 }
  0x36   :  { %1335 = vmatpush3.bf16.msra.mxu1 %v1334_v44  ;;  %1305 = vmatprep.subr.bf16.mxu0 %v1304_v45 }
  0x37   :  { %1077 = vmatmul.mubr.msk.f32.gmra.mrb[12].mxu0 %vm70_vm0, %v44_v40  ;;  %1337 = vmatprep.subr.bf16.mxu1 %v1336_v48 }
  0x38   :  { %1093 = vmatmul.mubr.msk.f32.gmra.mrb[12].mxu1 %vm70_vm0, %v44_v40  ;;  %225 = vmatprep.mubr.f32.mxu0 %v1400_v0 }
  0x39   :  { %386 = vmatprep.mubr.f32.mxu1 %v1400_v0  ;;  %1307 = vmatpush3.bf16.msra.mxu0 %v1306_v52 }
  0x3a   :  { %1339 = vmatpush3.bf16.msra.mxu1 %v1338_v53  ;;  %1309 = vmatprep.subr.bf16.mxu0 %v1308_v2 }
  0x3b   :  { %1078 = vmatmul.mubr.msk.f32.gmra.mrb[14].mxu0 %vm70_vm0, %v45_v51  ;;  %1341 = vmatprep.subr.bf16.mxu1 %v1340_v7 }
  0x3c   :  { %1094 = vmatmul.mubr.msk.f32.gmra.mrb[14].mxu1 %vm70_vm0, %v45_v51  ;;  %231 = vmatprep.mubr.f32.mxu0 %v1400_v0 }
  0x3d   :  { %392 = vmatprep.mubr.f32.mxu1 %v1400_v0  ;;  %1311 = vmatpush3.bf16.msra.mxu0 %v1310_v6 }
  0x3e   :  { %1343 = vmatpush3.bf16.msra.mxu1 %v1342_v10 }
  0x3f   :  { %1079 = vmatmul.mubr.msk.f32.gmra.mrb[16].mxu0 %vm70_vm0, %v46_v54 }
  0x40   :  { %1095 = vmatmul.mubr.msk.f32.gmra.mrb[16].mxu1 %vm70_vm0, %v46_v54  ;;  %237 = vmatprep.mubr.f32.mxu0 %v1400_v0 }
  0x41   :  { %398 = vmatprep.mubr.f32.mxu1 %v1400_v0 }
  0x43   :  { %1080 = vmatmul.mubr.msk.f32.gmra.mrb[18].mxu0 %vm70_vm0, %v47_v55 }
  0x44   :  { %1096 = vmatmul.mubr.msk.f32.gmra.mrb[18].mxu1 %vm70_vm0, %v47_v55  ;;  %243 = vmatprep.mubr.f32.mxu0 %v1400_v0 }
  0x45   :  { %404 = vmatprep.mubr.f32.mxu1 %v1400_v0 }
  0x47   :  { %1081 = vmatmul.mubr.msk.f32.gmra.mrb[20].mxu0 %vm70_vm0, %v48_v56 }
  0x48   :  { %1097 = vmatmul.mubr.msk.f32.gmra.mrb[20].mxu1 %vm70_vm0, %v48_v56  ;;  %249 = vmatprep.mubr.f32.mxu0 %v1400_v0 }
  0x49   :  { %410 = vmatprep.mubr.f32.mxu1 %v1400_v0 }
  0x4b   :  { %1082 = vmatmul.mubr.msk.f32.gmra.mrb[22].mxu0 %vm70_vm0, %v49_v57 }
  0x4c   :  { %1098 = vmatmul.mubr.msk.f32.gmra.mrb[22].mxu1 %vm70_vm0, %v49_v57  ;;  %255 = vmatprep.mubr.f32.mxu0 %v1400_v0 }
  0x4d   :  { %416 = vmatprep.mubr.f32.mxu1 %v1400_v0 }
  0x4f   :  { %1083 = vmatmul.mubr.msk.f32.gmra.mrb[24].mxu0 %vm70_vm0, %v50_v58 }
  0x50   :  { %1099 = vmatmul.mubr.msk.f32.gmra.mrb[24].mxu1 %vm70_vm0, %v50_v58  ;;  %261 = vmatprep.mubr.f32.mxu0 %v1400_v0 }
  0x51   :  { %422 = vmatprep.mubr.f32.mxu1 %v1400_v0 }
  0x53   :  { %1084 = vmatmul.mubr.msk.f32.gmra.mrb[26].mxu0 %vm70_vm0, %v51_v59 }
  0x54   :  { %1100 = vmatmul.mubr.msk.f32.gmra.mrb[26].mxu1 %vm70_vm0, %v51_v59  ;;  %267 = vmatprep.mubr.f32.mxu0 %v1400_v0 }
  0x55   :  { %428 = vmatprep.mubr.f32.mxu1 %v1400_v0 }
  0x57   :  { %1085 = vmatmul.mubr.msk.f32.gmra.mrb[28].mxu0 %vm70_vm0, %v52_v60 }
  0x58   :  { %1101 = vmatmul.mubr.msk.f32.gmra.mrb[28].mxu1 %vm70_vm0, %v52_v60  ;;  %273 = vmatprep.mubr.f32.mxu0 %v1400_v0 }
  0x59   :  { %434 = vmatprep.mubr.f32.mxu1 %v1400_v0  ;;  %v443_v0 = vlaneseq }
  0x5b   :  { %1086 = vmatmul.mubr.msk.f32.gmra.mrb[30].mxu0 %vm70_vm0, %v53_v61  ;;  %v444_v11 = vshrl.u32 %v443_v0, 7 }
  0x5c   :  { %1102 = vmatmul.mubr.msk.f32.gmra.mrb[30].mxu1 %vm70_vm0, %v53_v61 }
  0x5d   :  { %v445_v12 = vsub.s32 0, %v444_v11  ;;  %v453_v14 = vsub.s32 2, %v444_v11  ;;  %v449_v15 = vsub.s32 1, %v444_v11  ;;  %v457_v16 = vsub.s32 3, %v444_v11 }
  0x5f   :  { %v1618_v18 = vrot.slane %v441_v13, %v445_v12  ;;  %v1620_v19 = vrot.slane %v441_v13, %v453_v14  ;;  %v1622_v20 = vrot.slane %v441_v13, %v449_v15  ;;  %v1624_v21 = vrot.slane %v527_v17, %v445_v12 }
  0x60   :  { %v1626_v22 = vrot.slane %v441_v13, %v457_v16  ;;  %v1628_v24 = vrot.slane %v527_v17, %v453_v14  ;;  %v1630_v25 = vrot.slane %v527_v17, %v449_v15  ;;  %v1633_v29 = vrot.slane %v527_v17, %v457_v16 }
  0xf2   :  { %v185_v23 = vpop.f32.mrb[0].mxu0 }
  0xf3   :  { %v463_v26 = vmul.f32 %v1618_v18, %v185_v23  ;;  %v346_v27 = vpop.f32.mrb[0].mxu1  ;;  %v187_v28 = vpop.f32.mrb[1].mxu0 }
  0xf4   :  { %v465_v30 = vmul.f32 %v1620_v19, %v346_v27  ;;  %v464_v31 = vmul.f32 %v1622_v20, %v187_v28  ;;  %v348_v32 = vpop.f32.mrb[1].mxu1 }
  0xf5   :  { %v549_v33 = vadd.f32 %v1624_v21, %v463_v26  ;;  %v466_v34 = vmul.f32 %v1626_v22, %v348_v32 }
  0xf6   :  { %v551_v35 = vadd.f32 %v1628_v24, %v465_v30  ;;  %v550_v36 = vadd.f32 %v1630_v25, %v464_v31  ;;  %v191_v37 = vpop.f32.mrb[2].mxu0 }
  0xf7   :  { %v552_v38 = vadd.f32 %v1633_v29, %v466_v34  ;;  %v467_v39 = vmul.f32 %v1618_v18, %v191_v37  ;;  %v352_v40 = vpop.f32.mrb[2].mxu1  ;;  %v193_v41 = vpop.f32.mrb[3].mxu0  ;;  %v613_v47 = vmax.f32 %v549_v33, 0.0 }
  0xf8   :  { %v615_v42 = vmax.f32 %v551_v35, 0.0  ;;  %v614_v43 = vmax.f32 %v550_v36, 0.0  ;;  %v469_v44 = vmul.f32 %v1620_v19, %v352_v40  ;;  %v468_v45 = vmul.f32 %v1622_v20, %v193_v41  ;;  %v354_v46 = vpop.f32.mrb[3].mxu1 }
  0xf9   :  { %v616_v48 = vmax.f32 %v552_v38, 0.0  ;;  %v553_v49 = vadd.f32 %v1624_v21, %v467_v39  ;;  %v470_v50 = vmul.f32 %v1626_v22, %v354_v46 }
  0xfa   :  { %v555_v51 = vadd.f32 %v1628_v24, %v469_v44  ;;  %v554_v52 = vadd.f32 %v1630_v25, %v468_v45  ;;  %v197_v53 = vpop.f32.mrb[4].mxu0  ;;  %812 = vmatprep.mubr.f32.mxu0 %v614_v43 }
  0xfb   :  { %v556_v54 = vadd.f32 %v1633_v29, %v470_v50  ;;  %v471_v55 = vmul.f32 %v1618_v18, %v197_v53  ;;  %v358_v56 = vpop.f32.mrb[4].mxu1  ;;  %957 = vmatprep.mubr.f32.mxu1 %v616_v48  ;;  %v199_v57 = vpop.f32.mrb[5].mxu0  ;;  %813 = vmatmul.mubr.f32.vlgmr.msra.gmra.mrb[32].mxu0 %v613_v47  ;;  %v617_v63 = vmax.f32 %v553_v49, 0.0 }
  0xfc   :  { %v619_v58 = vmax.f32 %v555_v51, 0.0  ;;  %v618_v59 = vmax.f32 %v554_v52, 0.0  ;;  %v473_v60 = vmul.f32 %v1620_v19, %v358_v56  ;;  %v472_v61 = vmul.f32 %v1622_v20, %v199_v57  ;;  %v360_v62 = vpop.f32.mrb[5].mxu1  ;;  %958 = vmatmul.mubr.f32.vlgmr.msra.gmra.mrb[32].mxu1 %v615_v42 }
  0xfd   :  { %v620_v1 = vmax.f32 %v556_v54, 0.0  ;;  %v557_v2 = vadd.f32 %v1624_v21, %v471_v55  ;;  %v474_v3 = vmul.f32 %v1626_v22, %v360_v62 }
  0xfe   :  { %v559_v4 = vadd.f32 %v1628_v24, %v473_v60  ;;  %v558_v5 = vadd.f32 %v1630_v25, %v472_v61  ;;  %v203_v6 = vpop.f32.mrb[6].mxu0  ;;  %817 = vmatprep.mubr.f32.mxu0 %v618_v59 }
  0xff   :  { %v560_v7 = vadd.f32 %v1633_v29, %v474_v3  ;;  %v475_v8 = vmul.f32 %v1618_v18, %v203_v6  ;;  %v364_v9 = vpop.f32.mrb[6].mxu1  ;;  %962 = vmatprep.mubr.f32.mxu1 %v620_v1  ;;  %v205_v10 = vpop.f32.mrb[7].mxu0  ;;  %818 = vmatmul.mubr.f32.gmra.mrb[34].mxu0 %v617_v63  ;;  %v621_v15 = vmax.f32 %v557_v2, 0.0 }
 0x100   :  { %v623_v0 = vmax.f32 %v559_v4, 0.0  ;;  %v622_v11 = vmax.f32 %v558_v5, 0.0  ;;  %v477_v12 = vmul.f32 %v1620_v19, %v364_v9  ;;  %v476_v13 = vmul.f32 %v1622_v20, %v205_v10  ;;  %v366_v14 = vpop.f32.mrb[7].mxu1  ;;  %963 = vmatmul.mubr.f32.gmra.mrb[34].mxu1 %v619_v58 }
 0x101   :  { %v624_v16 = vmax.f32 %v560_v7, 0.0  ;;  %v561_v17 = vadd.f32 %v1624_v21, %v475_v8  ;;  %v478_v23 = vmul.f32 %v1626_v22, %v366_v14 }
 0x102   :  { %v563_v26 = vadd.f32 %v1628_v24, %v477_v12  ;;  %v562_v27 = vadd.f32 %v1630_v25, %v476_v13  ;;  %v209_v28 = vpop.f32.mrb[8].mxu0  ;;  %822 = vmatprep.mubr.f32.mxu0 %v622_v11 }
 0x103   :  { %v564_v30 = vadd.f32 %v1633_v29, %v478_v23  ;;  %v479_v31 = vmul.f32 %v1618_v18, %v209_v28  ;;  %v370_v32 = vpop.f32.mrb[8].mxu1  ;;  %967 = vmatprep.mubr.f32.mxu1 %v624_v16  ;;  %v211_v33 = vpop.f32.mrb[9].mxu0  ;;  %823 = vmatmul.mubr.f32.gmra.mrb[36].mxu0 %v621_v15  ;;  %v625_v39 = vmax.f32 %v561_v17, 0.0 }
 0x104   :  { %v627_v34 = vmax.f32 %v563_v26, 0.0  ;;  %v626_v35 = vmax.f32 %v562_v27, 0.0  ;;  %v481_v36 = vmul.f32 %v1620_v19, %v370_v32  ;;  %v480_v37 = vmul.f32 %v1622_v20, %v211_v33  ;;  %v372_v38 = vpop.f32.mrb[9].mxu1  ;;  %968 = vmatmul.mubr.f32.gmra.mrb[36].mxu1 %v623_v0 }
 0x105   :  { %v628_v40 = vmax.f32 %v564_v30, 0.0  ;;  %v565_v41 = vadd.f32 %v1624_v21, %v479_v31  ;;  %v482_v42 = vmul.f32 %v1626_v22, %v372_v38 }
 0x106   :  { %v567_v43 = vadd.f32 %v1628_v24, %v481_v36  ;;  %v566_v44 = vadd.f32 %v1630_v25, %v480_v37  ;;  %v215_v45 = vpop.f32.mrb[10].mxu0  ;;  %827 = vmatprep.mubr.f32.mxu0 %v626_v35 }
 0x107   :  { %v568_v46 = vadd.f32 %v1633_v29, %v482_v42  ;;  %v483_v47 = vmul.f32 %v1618_v18, %v215_v45  ;;  %v376_v48 = vpop.f32.mrb[10].mxu1  ;;  %972 = vmatprep.mubr.f32.mxu1 %v628_v40  ;;  %v217_v49 = vpop.f32.mrb[11].mxu0  ;;  %828 = vmatmul.mubr.f32.gmra.mrb[38].mxu0 %v625_v39  ;;  %v629_v55 = vmax.f32 %v565_v41, 0.0 }
 0x108   :  { %v631_v50 = vmax.f32 %v567_v43, 0.0  ;;  %v630_v51 = vmax.f32 %v566_v44, 0.0  ;;  %v485_v52 = vmul.f32 %v1620_v19, %v376_v48  ;;  %v484_v53 = vmul.f32 %v1622_v20, %v217_v49  ;;  %v378_v54 = vpop.f32.mrb[11].mxu1  ;;  %973 = vmatmul.mubr.f32.gmra.mrb[38].mxu1 %v627_v34 }
 0x109   :  { %v632_v56 = vmax.f32 %v568_v46, 0.0  ;;  %v569_v57 = vadd.f32 %v1624_v21, %v483_v47  ;;  %v486_v58 = vmul.f32 %v1626_v22, %v378_v54 }
 0x10a   :  { %v571_v59 = vadd.f32 %v1628_v24, %v485_v52  ;;  %v570_v60 = vadd.f32 %v1630_v25, %v484_v53  ;;  %v221_v61 = vpop.f32.mrb[12].mxu0  ;;  %832 = vmatprep.mubr.f32.mxu0 %v630_v51 }
 0x10b   :  { %v572_v62 = vadd.f32 %v1633_v29, %v486_v58  ;;  %v487_v63 = vmul.f32 %v1618_v18, %v221_v61  ;;  %v382_v1 = vpop.f32.mrb[12].mxu1  ;;  %977 = vmatprep.mubr.f32.mxu1 %v632_v56  ;;  %v223_v2 = vpop.f32.mrb[13].mxu0  ;;  %833 = vmatmul.mubr.f32.gmra.mrb[40].mxu0 %v629_v55  ;;  %v633_v8 = vmax.f32 %v569_v57, 0.0 }
 0x10c   :  { %v635_v3 = vmax.f32 %v571_v59, 0.0  ;;  %v634_v4 = vmax.f32 %v570_v60, 0.0  ;;  %v489_v5 = vmul.f32 %v1620_v19, %v382_v1  ;;  %v488_v6 = vmul.f32 %v1622_v20, %v223_v2  ;;  %v384_v7 = vpop.f32.mrb[13].mxu1  ;;  %978 = vmatmul.mubr.f32.gmra.mrb[40].mxu1 %v631_v50 }
 0x10d   :  { %v636_v9 = vmax.f32 %v572_v62, 0.0  ;;  %v573_v10 = vadd.f32 %v1624_v21, %v487_v63  ;;  %v490_v0 = vmul.f32 %v1626_v22, %v384_v7 }
 0x10e   :  { %v575_v11 = vadd.f32 %v1628_v24, %v489_v5  ;;  %v574_v12 = vadd.f32 %v1630_v25, %v488_v6  ;;  %v227_v13 = vpop.f32.mrb[14].mxu0  ;;  %837 = vmatprep.mubr.f32.mxu0 %v634_v4 }
 0x10f   :  { %v576_v14 = vadd.f32 %v1633_v29, %v490_v0  ;;  %v491_v15 = vmul.f32 %v1618_v18, %v227_v13  ;;  %v388_v16 = vpop.f32.mrb[14].mxu1  ;;  %982 = vmatprep.mubr.f32.mxu1 %v636_v9  ;;  %v229_v17 = vpop.f32.mrb[15].mxu0  ;;  %838 = vmatmul.mubr.f32.gmra.mrb[42].mxu0 %v633_v8  ;;  %v637_v31 = vmax.f32 %v573_v10, 0.0 }
 0x110   :  { %v639_v23 = vmax.f32 %v575_v11, 0.0  ;;  %v638_v26 = vmax.f32 %v574_v12, 0.0  ;;  %v493_v27 = vmul.f32 %v1620_v19, %v388_v16  ;;  %v492_v28 = vmul.f32 %v1622_v20, %v229_v17  ;;  %v390_v30 = vpop.f32.mrb[15].mxu1  ;;  %983 = vmatmul.mubr.f32.gmra.mrb[42].mxu1 %v635_v3 }
 0x111   :  { %v640_v32 = vmax.f32 %v576_v14, 0.0  ;;  %v577_v33 = vadd.f32 %v1624_v21, %v491_v15  ;;  %v494_v34 = vmul.f32 %v1626_v22, %v390_v30 }
 0x112   :  { %v579_v35 = vadd.f32 %v1628_v24, %v493_v27  ;;  %v578_v36 = vadd.f32 %v1630_v25, %v492_v28  ;;  %v233_v37 = vpop.f32.mrb[16].mxu0  ;;  %842 = vmatprep.mubr.f32.mxu0 %v638_v26 }
 0x113   :  { %v580_v38 = vadd.f32 %v1633_v29, %v494_v34  ;;  %v495_v39 = vmul.f32 %v1618_v18, %v233_v37  ;;  %v394_v40 = vpop.f32.mrb[16].mxu1  ;;  %987 = vmatprep.mubr.f32.mxu1 %v640_v32  ;;  %v235_v41 = vpop.f32.mrb[17].mxu0  ;;  %843 = vmatmul.mubr.f32.gmra.mrb[44].mxu0 %v637_v31  ;;  %v641_v47 = vmax.f32 %v577_v33, 0.0 }
 0x114   :  { %v643_v42 = vmax.f32 %v579_v35, 0.0  ;;  %v642_v43 = vmax.f32 %v578_v36, 0.0  ;;  %v497_v44 = vmul.f32 %v1620_v19, %v394_v40  ;;  %v496_v45 = vmul.f32 %v1622_v20, %v235_v41  ;;  %v396_v46 = vpop.f32.mrb[17].mxu1  ;;  %988 = vmatmul.mubr.f32.gmra.mrb[44].mxu1 %v639_v23 }
 0x115   :  { %v644_v48 = vmax.f32 %v580_v38, 0.0  ;;  %v581_v49 = vadd.f32 %v1624_v21, %v495_v39  ;;  %v498_v50 = vmul.f32 %v1626_v22, %v396_v46 }
 0x116   :  { %v583_v51 = vadd.f32 %v1628_v24, %v497_v44  ;;  %v582_v52 = vadd.f32 %v1630_v25, %v496_v45  ;;  %v239_v53 = vpop.f32.mrb[18].mxu0  ;;  %847 = vmatprep.mubr.f32.mxu0 %v642_v43 }
 0x117   :  { %v584_v54 = vadd.f32 %v1633_v29, %v498_v50  ;;  %v499_v55 = vmul.f32 %v1618_v18, %v239_v53  ;;  %v400_v56 = vpop.f32.mrb[18].mxu1  ;;  %992 = vmatprep.mubr.f32.mxu1 %v644_v48  ;;  %v241_v57 = vpop.f32.mrb[19].mxu0  ;;  %848 = vmatmul.mubr.f32.gmra.mrb[46].mxu0 %v641_v47  ;;  %v645_v63 = vmax.f32 %v581_v49, 0.0 }
 0x118   :  { %v647_v58 = vmax.f32 %v583_v51, 0.0  ;;  %v646_v59 = vmax.f32 %v582_v52, 0.0  ;;  %v501_v60 = vmul.f32 %v1620_v19, %v400_v56  ;;  %v500_v61 = vmul.f32 %v1622_v20, %v241_v57  ;;  %v402_v62 = vpop.f32.mrb[19].mxu1  ;;  %993 = vmatmul.mubr.f32.gmra.mrb[46].mxu1 %v643_v42 }
 0x119   :  { %v648_v1 = vmax.f32 %v584_v54, 0.0  ;;  %v585_v2 = vadd.f32 %v1624_v21, %v499_v55  ;;  %v502_v3 = vmul.f32 %v1626_v22, %v402_v62 }
 0x11a   :  { %v587_v4 = vadd.f32 %v1628_v24, %v501_v60  ;;  %v586_v5 = vadd.f32 %v1630_v25, %v500_v61  ;;  %v245_v6 = vpop.f32.mrb[20].mxu0  ;;  %852 = vmatprep.mubr.f32.mxu0 %v646_v59 }
 0x11b   :  { %v588_v7 = vadd.f32 %v1633_v29, %v502_v3  ;;  %v503_v8 = vmul.f32 %v1618_v18, %v245_v6  ;;  %v406_v9 = vpop.f32.mrb[20].mxu1  ;;  %997 = vmatprep.mubr.f32.mxu1 %v648_v1  ;;  %v247_v10 = vpop.f32.mrb[21].mxu0  ;;  %853 = vmatmul.mubr.f32.gmra.mrb[48].mxu0 %v645_v63  ;;  %v649_v15 = vmax.f32 %v585_v2, 0.0 }
 0x11c   :  { %v651_v0 = vmax.f32 %v587_v4, 0.0  ;;  %v650_v11 = vmax.f32 %v586_v5, 0.0  ;;  %v505_v12 = vmul.f32 %v1620_v19, %v406_v9  ;;  %v504_v13 = vmul.f32 %v1622_v20, %v247_v10  ;;  %v408_v14 = vpop.f32.mrb[21].mxu1  ;;  %998 = vmatmul.mubr.f32.gmra.mrb[48].mxu1 %v647_v58 }
 0x11d   :  { %v652_v16 = vmax.f32 %v588_v7, 0.0  ;;  %v589_v17 = vadd.f32 %v1624_v21, %v503_v8  ;;  %v506_v23 = vmul.f32 %v1626_v22, %v408_v14 }
 0x11e   :  { %v591_v26 = vadd.f32 %v1628_v24, %v505_v12  ;;  %v590_v27 = vadd.f32 %v1630_v25, %v504_v13  ;;  %v251_v28 = vpop.f32.mrb[22].mxu0  ;;  %857 = vmatprep.mubr.f32.mxu0 %v650_v11 }
 0x11f   :  { %v592_v30 = vadd.f32 %v1633_v29, %v506_v23  ;;  %v507_v31 = vmul.f32 %v1618_v18, %v251_v28  ;;  %v412_v32 = vpop.f32.mrb[22].mxu1  ;;  %1002 = vmatprep.mubr.f32.mxu1 %v652_v16  ;;  %v253_v33 = vpop.f32.mrb[23].mxu0  ;;  %858 = vmatmul.mubr.f32.gmra.mrb[50].mxu0 %v649_v15  ;;  %v653_v39 = vmax.f32 %v589_v17, 0.0 }
 0x120   :  { %v655_v34 = vmax.f32 %v591_v26, 0.0  ;;  %v654_v35 = vmax.f32 %v590_v27, 0.0  ;;  %v509_v36 = vmul.f32 %v1620_v19, %v412_v32  ;;  %v508_v37 = vmul.f32 %v1622_v20, %v253_v33  ;;  %v414_v38 = vpop.f32.mrb[23].mxu1  ;;  %1003 = vmatmul.mubr.f32.gmra.mrb[50].mxu1 %v651_v0 }
 0x121   :  { %v656_v40 = vmax.f32 %v592_v30, 0.0  ;;  %v593_v41 = vadd.f32 %v1624_v21, %v507_v31  ;;  %v510_v42 = vmul.f32 %v1626_v22, %v414_v38 }
 0x122   :  { %v595_v43 = vadd.f32 %v1628_v24, %v509_v36  ;;  %v594_v44 = vadd.f32 %v1630_v25, %v508_v37  ;;  %v257_v45 = vpop.f32.mrb[24].mxu0  ;;  %862 = vmatprep.mubr.f32.mxu0 %v654_v35 }
 0x123   :  { %v596_v46 = vadd.f32 %v1633_v29, %v510_v42  ;;  %v511_v47 = vmul.f32 %v1618_v18, %v257_v45  ;;  %v418_v48 = vpop.f32.mrb[24].mxu1  ;;  %1007 = vmatprep.mubr.f32.mxu1 %v656_v40  ;;  %v259_v49 = vpop.f32.mrb[25].mxu0  ;;  %863 = vmatmul.mubr.f32.gmra.mrb[52].mxu0 %v653_v39  ;;  %v657_v55 = vmax.f32 %v593_v41, 0.0 }
 0x124   :  { %v659_v50 = vmax.f32 %v595_v43, 0.0  ;;  %v658_v51 = vmax.f32 %v594_v44, 0.0  ;;  %v513_v52 = vmul.f32 %v1620_v19, %v418_v48  ;;  %v512_v53 = vmul.f32 %v1622_v20, %v259_v49  ;;  %v420_v54 = vpop.f32.mrb[25].mxu1  ;;  %1008 = vmatmul.mubr.f32.gmra.mrb[52].mxu1 %v655_v34 }
 0x125   :  { %v660_v56 = vmax.f32 %v596_v46, 0.0  ;;  %v597_v57 = vadd.f32 %v1624_v21, %v511_v47  ;;  %v514_v58 = vmul.f32 %v1626_v22, %v420_v54 }
 0x126   :  { %v599_v59 = vadd.f32 %v1628_v24, %v513_v52  ;;  %v598_v60 = vadd.f32 %v1630_v25, %v512_v53  ;;  %v263_v61 = vpop.f32.mrb[26].mxu0  ;;  %867 = vmatprep.mubr.f32.mxu0 %v658_v51 }
 0x127   :  { %v600_v62 = vadd.f32 %v1633_v29, %v514_v58  ;;  %v515_v63 = vmul.f32 %v1618_v18, %v263_v61  ;;  %v424_v1 = vpop.f32.mrb[26].mxu1  ;;  %1012 = vmatprep.mubr.f32.mxu1 %v660_v56  ;;  %v265_v2 = vpop.f32.mrb[27].mxu0  ;;  %868 = vmatmul.mubr.f32.gmra.mrb[54].mxu0 %v657_v55  ;;  %v661_v8 = vmax.f32 %v597_v57, 0.0 }
 0x128   :  { %v663_v3 = vmax.f32 %v599_v59, 0.0  ;;  %v662_v4 = vmax.f32 %v598_v60, 0.0  ;;  %v517_v5 = vmul.f32 %v1620_v19, %v424_v1  ;;  %v516_v6 = vmul.f32 %v1622_v20, %v265_v2  ;;  %v426_v7 = vpop.f32.mrb[27].mxu1  ;;  %1013 = vmatmul.mubr.f32.gmra.mrb[54].mxu1 %v659_v50 }
 0x129   :  { %v664_v9 = vmax.f32 %v600_v62, 0.0  ;;  %v601_v10 = vadd.f32 %v1624_v21, %v515_v63  ;;  %v518_v0 = vmul.f32 %v1626_v22, %v426_v7 }
 0x12a   :  { %v603_v11 = vadd.f32 %v1628_v24, %v517_v5  ;;  %v602_v12 = vadd.f32 %v1630_v25, %v516_v6  ;;  %v269_v13 = vpop.f32.mrb[28].mxu0  ;;  %872 = vmatprep.mubr.f32.mxu0 %v662_v4 }
 0x12b   :  { %v604_v14 = vadd.f32 %v1633_v29, %v518_v0  ;;  %v519_v15 = vmul.f32 %v1618_v18, %v269_v13  ;;  %v430_v16 = vpop.f32.mrb[28].mxu1  ;;  %1017 = vmatprep.mubr.f32.mxu1 %v664_v9  ;;  %v271_v17 = vpop.f32.mrb[29].mxu0  ;;  %873 = vmatmul.mubr.f32.gmra.mrb[56].mxu0 %v661_v8  ;;  %v665_v31 = vmax.f32 %v601_v10, 0.0 }
 0x12c   :  { %v667_v23 = vmax.f32 %v603_v11, 0.0  ;;  %v666_v26 = vmax.f32 %v602_v12, 0.0  ;;  %v521_v27 = vmul.f32 %v1620_v19, %v430_v16  ;;  %v520_v28 = vmul.f32 %v1622_v20, %v271_v17  ;;  %v432_v30 = vpop.f32.mrb[29].mxu1  ;;  %1018 = vmatmul.mubr.f32.gmra.mrb[56].mxu1 %v663_v3 }
 0x12d   :  { %v668_v32 = vmax.f32 %v604_v14, 0.0  ;;  %v605_v33 = vadd.f32 %v1624_v21, %v519_v15  ;;  %v522_v34 = vmul.f32 %v1626_v22, %v432_v30 }
 0x12e   :  { %v607_v35 = vadd.f32 %v1628_v24, %v521_v27  ;;  %v606_v36 = vadd.f32 %v1630_v25, %v520_v28  ;;  %v275_v37 = vpop.f32.mrb[30].mxu0  ;;  %877 = vmatprep.mubr.f32.mxu0 %v666_v26 }
 0x12f   :  { %v608_v38 = vadd.f32 %v1633_v29, %v522_v34  ;;  %v523_v39 = vmul.f32 %v1618_v18, %v275_v37  ;;  %v436_v40 = vpop.f32.mrb[30].mxu1  ;;  %1022 = vmatprep.mubr.f32.mxu1 %v668_v32  ;;  %v277_v41 = vpop.f32.mrb[31].mxu0  ;;  %878 = vmatmul.mubr.f32.gmra.mrb[58].mxu0 %v665_v31  ;;  %v669_v47 = vmax.f32 %v605_v33, 0.0 }
 0x130   :  { %v671_v42 = vmax.f32 %v607_v35, 0.0  ;;  %v670_v43 = vmax.f32 %v606_v36, 0.0  ;;  %v525_v44 = vmul.f32 %v1620_v19, %v436_v40  ;;  %v524_v45 = vmul.f32 %v1622_v20, %v277_v41  ;;  %v438_v46 = vpop.f32.mrb[31].mxu1  ;;  %1023 = vmatmul.mubr.f32.gmra.mrb[58].mxu1 %v667_v23 }
 0x131   :  { %v672_v48 = vmax.f32 %v608_v38, 0.0  ;;  %v609_v49 = vadd.f32 %v1624_v21, %v523_v39  ;;  %v526_v50 = vmul.f32 %v1626_v22, %v438_v46 }
 0x132   :  { %v611_v18 = vadd.f32 %v1628_v24, %v525_v44  ;;  %v610_v51 = vadd.f32 %v1630_v25, %v524_v45  ;;  %882 = vmatprep.mubr.f32.mxu0 %v670_v43  ;;  %v1765_v24 = vld [vmem:[%s1803_s5] ss:$0 sm:$0xff]  ;;  %s1401_s5 = smov [#allocation5]  }
 0x133   :  { %v612_v52 = vadd.f32 %v1633_v29, %v526_v50  ;;  %1027 = vmatprep.mubr.f32.mxu1 %v672_v48  ;;  %883 = vmatmul.mubr.f32.gmra.mrb[60].mxu0 %v669_v47  ;;  %v673_v20 = vmax.f32 %v609_v49, 0.0  ;;  %s1059_s29 = sshll.u32 %s1401_s5, 4  ;;  %s1060_s29 = int_to_ptr.vmem [resolvable:$true] %s1059_s29 }
 0x134   :  { %v675_v19 = vmax.f32 %v611_v18, 0.0  ;;  %v674_v53 = vmax.f32 %v610_v51, 0.0  ;;  %1028 = vmatmul.mubr.f32.gmra.mrb[60].mxu1 %v671_v42  ;;  %s1371_s30 = scalar_lea.vmem %s1060_s29, 2048  ;;  %p1376_p9 = scmp.lt.s32.totalorder %s1060_s29, %s1060_s29 }
 0x135   :  { %v676_v54 = vmax.f32 %v612_v52, 0.0  ;;  %p1372_p8 = scmp.ne.s32.totalorder %s1060_s29, %s1371_s30  ;;  %p1377_p10 = scmp.lt.s32.totalorder %s1371_s30, %s1371_s30 }
 0x136   :  { %887 = vmatprep.mubr.f32.mxu0 %v674_v53 }
 0x137   :  { %1032 = vmatprep.mubr.f32.mxu1 %v676_v54  ;;  %888 = vmatmul.mubr.f32.gmra.mrb[62].mxu0 %v673_v20  ;;  %p1378_p11 = por %p1377_p10, %p1376_p9 }
 0x138   :  { %1033 = vmatmul.mubr.f32.gmra.mrb[62].mxu1 %v675_v19 }
 0x139   :  { %p1379_p12 = pnand %p1378_p11, %p1372_p8 }
 0x1ce   :  { %v1136_v21 = vpop.f32.mrb[32].mxu0 }
 0x1cf   :  { %v1216_v22 = vpop.f32.mrb[32].mxu1  ;;  %v1137_v25 = vpop.f32.mrb[33].mxu0 }
 0x1d0   :  { %v1138_v29 = vadd.f32 %v1137_v25, %v1136_v21  ;;  %v1217_v55 = vpop.f32.mrb[33].mxu1 }
 0x1d1   :  { %v1218_v56 = vadd.f32 %v1217_v55, %v1216_v22 }
 0x1d2   :  { %v815_v57 = vadd.f32 %v1138_v29, %v1765_v24  ;;  %v1139_v58 = vpop.f32.mrb[34].mxu0 }
 0x1d3   :  { %v1219_v59 = vpop.f32.mrb[34].mxu1  ;;  %v1140_v60 = vpop.f32.mrb[35].mxu0 }
 0x1d4   :  { %v960_v61 = vadd.f32 %v1218_v56, %v815_v57  ;;  %v1141_v62 = vadd.f32 %v1140_v60, %v1139_v58  ;;  %v1220_v63 = vpop.f32.mrb[35].mxu1 }
 0x1d5   :  { %v1221_v1 = vadd.f32 %v1220_v63, %v1219_v59 }
 0x1d6   :  { %1038 = vst [vmem:[#allocation5] sm:$0xff] %v960_v61  ;;  %v820_v2 = vadd.f32 %v1141_v62, %v1765_v24  ;;  %v1142_v3 = vpop.f32.mrb[36].mxu0 }
 0x1d7   :  { %v1222_v4 = vpop.f32.mrb[36].mxu1  ;;  %v1143_v5 = vpop.f32.mrb[37].mxu0 }
 0x1d8   :  { %v965_v6 = vadd.f32 %v1221_v1, %v820_v2  ;;  %v1144_v7 = vadd.f32 %v1143_v5, %v1142_v3  ;;  %v1223_v8 = vpop.f32.mrb[37].mxu1 }
 0x1d9   :  { %v1224_v9 = vadd.f32 %v1223_v8, %v1222_v4 }
 0x1da   :  { %1039 = vst [vmem:[#allocation5 + $0x8] sm:$0xff] %v965_v6  ;;  %v825_v10 = vadd.f32 %v1144_v7, %v1765_v24  ;;  %v1145_v0 = vpop.f32.mrb[38].mxu0 }
 0x1db   :  { %v1225_v11 = vpop.f32.mrb[38].mxu1  ;;  %v1146_v12 = vpop.f32.mrb[39].mxu0 }
 0x1dc   :  { %v970_v13 = vadd.f32 %v1224_v9, %v825_v10  ;;  %v1147_v14 = vadd.f32 %v1146_v12, %v1145_v0  ;;  %v1226_v15 = vpop.f32.mrb[39].mxu1 }
 0x1dd   :  { %v1227_v16 = vadd.f32 %v1226_v15, %v1225_v11 }
 0x1de   :  { %1040 = vst [vmem:[#allocation5 + $0x10] sm:$0xff] %v970_v13  ;;  %v830_v17 = vadd.f32 %v1147_v14, %v1765_v24  ;;  %v1148_v23 = vpop.f32.mrb[40].mxu0 }
 0x1df   :  { %v1228_v26 = vpop.f32.mrb[40].mxu1  ;;  %v1149_v27 = vpop.f32.mrb[41].mxu0 }
 0x1e0   :  { %v975_v28 = vadd.f32 %v1227_v16, %v830_v17  ;;  %v1150_v30 = vadd.f32 %v1149_v27, %v1148_v23  ;;  %v1229_v31 = vpop.f32.mrb[41].mxu1 }
 0x1e1   :  { %v1230_v32 = vadd.f32 %v1229_v31, %v1228_v26 }
 0x1e2   :  { %1041 = vst [vmem:[#allocation5 + $0x18] sm:$0xff] %v975_v28  ;;  %v835_v33 = vadd.f32 %v1150_v30, %v1765_v24  ;;  %v1151_v34 = vpop.f32.mrb[42].mxu0 }
 0x1e3   :  { %v1231_v35 = vpop.f32.mrb[42].mxu1  ;;  %v1152_v36 = vpop.f32.mrb[43].mxu0 }
 0x1e4   :  { %v980_v37 = vadd.f32 %v1230_v32, %v835_v33  ;;  %v1153_v38 = vadd.f32 %v1152_v36, %v1151_v34  ;;  %v1232_v39 = vpop.f32.mrb[43].mxu1 }
 0x1e5   :  { %v1233_v40 = vadd.f32 %v1232_v39, %v1231_v35 }
 0x1e6   :  { %1042 = vst [vmem:[#allocation5 + $0x20] sm:$0xff] %v980_v37  ;;  %v840_v41 = vadd.f32 %v1153_v38, %v1765_v24  ;;  %v1154_v42 = vpop.f32.mrb[44].mxu0 }
 0x1e7   :  { %v1234_v43 = vpop.f32.mrb[44].mxu1  ;;  %v1155_v44 = vpop.f32.mrb[45].mxu0 }
 0x1e8   :  { %v985_v45 = vadd.f32 %v1233_v40, %v840_v41  ;;  %v1156_v46 = vadd.f32 %v1155_v44, %v1154_v42  ;;  %v1235_v47 = vpop.f32.mrb[45].mxu1 }
 0x1e9   :  { %v1236_v48 = vadd.f32 %v1235_v47, %v1234_v43 }
 0x1ea   :  { %1043 = vst [vmem:[#allocation5 + $0x28] sm:$0xff] %v985_v45  ;;  %v845_v49 = vadd.f32 %v1156_v46, %v1765_v24  ;;  %v1157_v50 = vpop.f32.mrb[46].mxu0 }
 0x1eb   :  { %v1237_v18 = vpop.f32.mrb[46].mxu1  ;;  %v1158_v51 = vpop.f32.mrb[47].mxu0 }
 0x1ec   :  { %v990_v52 = vadd.f32 %v1236_v48, %v845_v49  ;;  %v1159_v19 = vadd.f32 %v1158_v51, %v1157_v50  ;;  %v1238_v53 = vpop.f32.mrb[47].mxu1 }
 0x1ed   :  { %v1239_v20 = vadd.f32 %v1238_v53, %v1237_v18 }
 0x1ee   :  { %1044 = vst [vmem:[#allocation5 + $0x30] sm:$0xff] %v990_v52  ;;  %v850_v54 = vadd.f32 %v1159_v19, %v1765_v24  ;;  %v1160_v21 = vpop.f32.mrb[48].mxu0 }
 0x1ef   :  { %v1240_v22 = vpop.f32.mrb[48].mxu1  ;;  %v1161_v25 = vpop.f32.mrb[49].mxu0 }
 0x1f0   :  { %v995_v29 = vadd.f32 %v1239_v20, %v850_v54  ;;  %v1162_v55 = vadd.f32 %v1161_v25, %v1160_v21  ;;  %v1241_v56 = vpop.f32.mrb[49].mxu1 }
 0x1f1   :  { %v1242_v57 = vadd.f32 %v1241_v56, %v1240_v22 }
 0x1f2   :  { %1045 = vst [vmem:[#allocation5 + $0x38] sm:$0xff] %v995_v29  ;;  %v855_v58 = vadd.f32 %v1162_v55, %v1765_v24  ;;  %v1163_v59 = vpop.f32.mrb[50].mxu0 }
 0x1f3   :  { %v1243_v60 = vpop.f32.mrb[50].mxu1  ;;  %v1164_v61 = vpop.f32.mrb[51].mxu0 }
 0x1f4   :  { %v1000_v62 = vadd.f32 %v1242_v57, %v855_v58  ;;  %v1165_v63 = vadd.f32 %v1164_v61, %v1163_v59  ;;  %v1244_v1 = vpop.f32.mrb[51].mxu1 }
 0x1f5   :  { %v1245_v2 = vadd.f32 %v1244_v1, %v1243_v60 }
 0x1f6   :  { %1046 = vst [vmem:[#allocation5 + $0x40] sm:$0xff] %v1000_v62  ;;  %v860_v3 = vadd.f32 %v1165_v63, %v1765_v24  ;;  %v1166_v4 = vpop.f32.mrb[52].mxu0 }
 0x1f7   :  { %v1246_v5 = vpop.f32.mrb[52].mxu1  ;;  %v1167_v6 = vpop.f32.mrb[53].mxu0 }
 0x1f8   :  { %v1005_v7 = vadd.f32 %v1245_v2, %v860_v3  ;;  %v1168_v8 = vadd.f32 %v1167_v6, %v1166_v4  ;;  %v1247_v9 = vpop.f32.mrb[53].mxu1 }
 0x1f9   :  { %v1248_v10 = vadd.f32 %v1247_v9, %v1246_v5 }
 0x1fa   :  { %1047 = vst [vmem:[#allocation5 + $0x48] sm:$0xff] %v1005_v7  ;;  %v865_v0 = vadd.f32 %v1168_v8, %v1765_v24  ;;  %v1169_v11 = vpop.f32.mrb[54].mxu0 }
 0x1fb   :  { %v1249_v12 = vpop.f32.mrb[54].mxu1  ;;  %v1170_v13 = vpop.f32.mrb[55].mxu0 }
 0x1fc   :  { %v1010_v14 = vadd.f32 %v1248_v10, %v865_v0  ;;  %v1171_v15 = vadd.f32 %v1170_v13, %v1169_v11  ;;  %v1250_v16 = vpop.f32.mrb[55].mxu1 }
 0x1fd   :  { %v1251_v17 = vadd.f32 %v1250_v16, %v1249_v12 }
 0x1fe   :  { %1048 = vst [vmem:[#allocation5 + $0x50] sm:$0xff] %v1010_v14  ;;  %v870_v23 = vadd.f32 %v1171_v15, %v1765_v24  ;;  %v1172_v26 = vpop.f32.mrb[56].mxu0 }
 0x1ff   :  { %v1252_v27 = vpop.f32.mrb[56].mxu1  ;;  %v1173_v28 = vpop.f32.mrb[57].mxu0 }
 0x200   :  { %v1015_v30 = vadd.f32 %v1251_v17, %v870_v23  ;;  %v1174_v31 = vadd.f32 %v1173_v28, %v1172_v26  ;;  %v1253_v32 = vpop.f32.mrb[57].mxu1 }
 0x201   :  { %v1254_v33 = vadd.f32 %v1253_v32, %v1252_v27 }
 0x202   :  { %1049 = vst [vmem:[#allocation5 + $0x58] sm:$0xff] %v1015_v30  ;;  %v875_v34 = vadd.f32 %v1174_v31, %v1765_v24  ;;  %v1175_v35 = vpop.f32.mrb[58].mxu0 }
 0x203   :  { %v1255_v36 = vpop.f32.mrb[58].mxu1  ;;  %v1176_v37 = vpop.f32.mrb[59].mxu0 }
 0x204   :  { %v1020_v38 = vadd.f32 %v1254_v33, %v875_v34  ;;  %v1177_v39 = vadd.f32 %v1176_v37, %v1175_v35  ;;  %v1256_v40 = vpop.f32.mrb[59].mxu1 }
 0x205   :  { %v1257_v41 = vadd.f32 %v1256_v40, %v1255_v36 }
 0x206   :  { %1050 = vst [vmem:[#allocation5 + $0x60] sm:$0xff] %v1020_v38  ;;  %v880_v42 = vadd.f32 %v1177_v39, %v1765_v24  ;;  %v1178_v43 = vpop.f32.mrb[60].mxu0 }
 0x207   :  { %v1258_v44 = vpop.f32.mrb[60].mxu1  ;;  %v1179_v45 = vpop.f32.mrb[61].mxu0 }
 0x208   :  { %v1025_v46 = vadd.f32 %v1257_v41, %v880_v42  ;;  %v1180_v47 = vadd.f32 %v1179_v45, %v1178_v43  ;;  %v1259_v48 = vpop.f32.mrb[61].mxu1 }
 0x209   :  { %v1260_v49 = vadd.f32 %v1259_v48, %v1258_v44 }
 0x20a   :  { %1051 = vst [vmem:[#allocation5 + $0x68] sm:$0xff] %v1025_v46  ;;  %v885_v50 = vadd.f32 %v1180_v47, %v1765_v24  ;;  %v1181_v18 = vpop.f32.mrb[62].mxu0 }
 0x20b   :  { %v1261_v51 = vpop.f32.mrb[62].mxu1  ;;  %v1182_v52 = vpop.f32.mrb[63].mxu0 }
 0x20c   :  { %v1030_v19 = vadd.f32 %v1260_v49, %v885_v50  ;;  %v1183_v53 = vadd.f32 %v1182_v52, %v1181_v18  ;;  %v1262_v20 = vpop.f32.mrb[63].mxu1 }
 0x20d   :  { %v1263_v54 = vadd.f32 %v1262_v20, %v1261_v51 }
 0x20e   :  { %1052 = vst [vmem:[#allocation5 + $0x70] sm:$0xff] %v1030_v19  ;;  %v890_v21 = vadd.f32 %v1183_v53, %v1765_v24 }
 0x210   :  { %v1035_v22 = vadd.f32 %v1263_v54, %v890_v21 }
 0x212   :  { %1053 = vst [vmem:[#allocation5 + $0x78] sm:$0xff] %v1035_v22 }
 0x213   :  { %1382 = shalt.err (!%p1379_p12)
}
 0x214   :  { %s1383_s11 = scalar_lea.hbm %s1804_s6, 2048 }
 0x215   :  { %p1384_p13 = scmp.ne.s32.totalorder %s1804_s6, %s1383_s11  ;;  %p1387_p0 = scmp.lt.u32.totalorder %s1383_s11, %s1804_s6 }
 0x217   :  { %p1389_p1 = pnand %p1387_p0, %p1384_p13 }
 0x219   :  { %1392 = shalt.err (!%p1389_p1)
}
 0x21a   :  { %1065 = dma.vmem_to_hbm [thread:$0]  %s1060_s29, 2048, %s1804_s6, [#allocation4], %s1398_s7, %s1398_s7, %s1399_s8  }
 0x21b   :  { %1395 = dma.done.wait [#allocation4], 2048  }
 0x21c   :  { %1396 = vsyncadd [#allocation4], 4294965248 }
 0x21d   :  { %1069 = vsyncpa [#allocation3], 1 }
 0x21e   :  { %1070 = vsyncpa [#allocation4], 1 }

</bundles_post_ra>
